<compile_context>
chip_gen: v5e
topology: v5e:2x2
jax: 0.10.0
libtpu: 0.0.40
codegen_flags: <defaults>
</compile_context>

<pallas_src>
import numpy as np
import jax
import jax.numpy as jnp
from jax.experimental import pallas as pl
from jax.experimental.pallas import tpu as pltpu

# ----------------------------- FFT config ------------------------------------
N_FFT = 64
WIN_LENGTH = 64
HOP_LENGTH = 32
N_FREQ = N_FFT // 2 + 1          # 33 one-sided bins
OUT_LANES = 128                  # lane-dense per-batch partials row
INV_LN10 = float(1.0 / np.log(10.0))


def _hann_sqrt_window(win_length):
    # torch.hann_window(win_length) is periodic; .pow(0.5)
    n = np.arange(win_length)
    hann = 0.5 - 0.5 * np.cos(2.0 * np.pi * n / win_length)
    return np.sqrt(hann).astype(np.float32)


def _synthesis_bases():
    """(n_fft, F) cosine / sine synthesis bases for the one-sided inverse rFFT.

    The sqrt-hann synthesis window and the torch.istft window-envelope normalisation
    (valid on the fully-overlapped, center-trimmed region the loss actually uses) are
    folded in, so the kernel's matmul output can be overlap-added directly.
    Imaginary parts of the DC / Nyquist bins contribute nothing (their sine rows are
    exactly zero) - same behaviour as torch.fft.irfft on real-signal STFTs.
    """
    window = _hann_sqrt_window(WIN_LENGTH).astype(np.float64)
    n = np.arange(N_FFT, dtype=np.float64)[:, None]       # (n_fft, 1)
    k = np.arange(N_FREQ, dtype=np.float64)[None, :]      # (1, F)
    ang = 2.0 * np.pi * k * n / N_FFT
    w = np.full((1, N_FREQ), 2.0)
    w[0, 0] = 1.0
    w[0, -1] = 1.0
    cosb = (w / N_FFT) * np.cos(ang)                      # multiplies Re(X)
    sinb = -(w / N_FFT) * np.sin(ang)                     # multiplies Im(X)
    cosb *= window[:, None]
    sinb *= window[:, None]
    # OLA envelope: with hop == n_fft//2 every kept output sample is covered by exactly
    # two frames, so env[i mod hop] = w^2[i] + w^2[i + hop]; fold 1/env per frame sample.
    w2 = window ** 2
    inv_env = 1.0 / (w2[:HOP_LENGTH] + w2[HOP_LENGTH:])
    scale = np.concatenate([inv_env, inv_env])[:, None]   # per frame sample n -> n % hop
    cosb *= scale
    sinb *= scale
    return cosb.astype(np.float32), sinb.astype(np.float32)


# ----------------------------- fused Pallas kernel ----------------------------
def _loss_hybrid_kernel(pr_ref, pi_ref, tr_ref, ti_ref, cos_ref, sin_ref, out_ref):
    pr = pr_ref[0]                      # (F, T)  pred real
    pi = pi_ref[0]                      # (F, T)  pred imag
    tr = tr_ref[0]                      # (F, T)  true real
    ti = ti_ref[0]                      # (F, T)  true imag
    t_frames = pr.shape[1]

    # ---- compressed spectral losses (partial sums for this batch element) ----
    pmag = jnp.sqrt(pr * pr + pi * pi + 1e-12)
    tmag = jnp.sqrt(tr * tr + ti * ti + 1e-12)
    pcmp = jnp.exp(-0.7 * jnp.log(pmag))          # pmag ** -0.7   (EUP)
    tcmp = jnp.exp(-0.7 * jnp.log(tmag))          # tmag ** -0.7
    d_re = pr * pcmp - tr * tcmp                  # real/mag**0.7 difference
    d_im = pi * pcmp - ti * tcmp
    d_mag = pmag * pcmp - tmag * tcmp             # mag**0.3 == mag * mag**-0.7
    real_sq = jnp.sum(d_re * d_re).reshape(1, 1)
    imag_sq = jnp.sum(d_im * d_im).reshape(1, 1)
    mag_sq = jnp.sum(d_mag * d_mag).reshape(1, 1)

    # ---- ISTFT frame synthesis on the MXU (window + 1/OLA-envelope pre-folded) ----
    cosb = cos_ref[...]                            # (n_fft, F), resident
    sinb = sin_ref[...]
    fp = (jnp.dot(cosb, pr, preferred_element_type=jnp.float32)
          + jnp.dot(sinb, pi, preferred_element_type=jnp.float32))   # (n_fft, T)
    ft = (jnp.dot(cosb, tr, preferred_element_type=jnp.float32)
          + jnp.dot(sinb, ti, preferred_element_type=jnp.float32))   # (n_fft, T)

    # ---- overlap-add as shift-and-add (hop == n_fft//2) + center=True trim ----
    # kept output chunk j (j = 0..T-2)  =  frame[j+1, :hop] + frame[j, hop:]
    y_pred = fp[:HOP_LENGTH, 1:] + fp[HOP_LENGTH:, : t_frames - 1]   # (hop, T-1)
    y_true = ft[:HOP_LENGTH, 1:] + ft[HOP_LENGTH:, : t_frames - 1]

    # ---- per-batch SI-SNR term (order of samples is irrelevant for the sums) ----
    dot = jnp.sum(y_true * y_pred).reshape(1, 1)
    energy = jnp.sum(y_true * y_true).reshape(1, 1)
    alpha = dot / (energy + 1e-8)
    s = alpha * y_true                              # projected "true" signal
    diff = y_pred - s
    num = jnp.sum(s * s).reshape(1, 1)
    den = jnp.sum(diff * diff).reshape(1, 1)
    sisnr_term = -jnp.log(num / den + 1e-8) * INV_LN10     # == -log10(num/den + 1e-8)

    # ---- lane-dense partials row: [real_sq, imag_sq, mag_sq, sisnr, 0, ...] ----
    lane = jax.lax.broadcasted_iota(jnp.int32, (1, OUT_LANES), 1)
    row = jnp.where(lane == 0, real_sq,
          jnp.where(lane == 1, imag_sq,
          jnp.where(lane == 2, mag_sq,
          jnp.where(lane == 3, sisnr_term, 0.0))))
    out_ref[0] = row


# ----------------------------- public wrapper ---------------------------------
def loss_hybrid(pred_stft, true_stft):
    """Forward pass of loss_hybrid. Inputs: (B, F, T, 2) float32 spectrograms."""
    B, F, T, _ = pred_stft.shape
    assert F == N_FREQ, f"expected {N_FREQ} one-sided bins, got {F}"
    assert T >= 2, "need at least 2 STFT frames (signal length = hop*(T-1))"

    cosb_np, sinb_np = _synthesis_bases()
    cosb = jnp.asarray(cosb_np)
    sinb = jnp.asarray(sinb_np)

    # Channel split is the only wrapper-side data movement (one strided read each);
    # the kernel then contracts over F directly in the native (F sublane, T lane) layout.
    pr = pred_stft[..., 0]
    pi = pred_stft[..., 1]
    tr = true_stft[..., 0]
    ti = true_stft[..., 1]

    spec_block = pl.BlockSpec((1, F, T), lambda b: (b, 0, 0))
    basis_block = pl.BlockSpec((N_FFT, F), lambda b: (0, 0))   # stays resident in VMEM

    partials = pl.pallas_call(
        _loss_hybrid_kernel,
        out_shape=jax.ShapeDtypeStruct((B, 1, OUT_LANES), jnp.float32),
        grid=(B,),
        in_specs=[spec_block, spec_block, spec_block, spec_block,
                  basis_block, basis_block],
        out_specs=pl.BlockSpec((1, 1, OUT_LANES), lambda b: (b, 0, 0)),
        compiler_params=pltpu.CompilerParams(
            dimension_semantics=("parallel",),          # megacore sharding on v7x
            vmem_limit_bytes=32 * 1024 * 1024),
    )(pr, pi, tr, ti, cosb, sinb)

    partials = partials[:, 0, :]                        # (B, 128)
    n_spec = float(B * F * T)
    real_loss = jnp.sum(partials[:, 0]) / n_spec
    imag_loss = jnp.sum(partials[:, 1]) / n_spec
    mag_loss = jnp.sum(partials[:, 2]) / n_spec
    sisnr = jnp.mean(partials[:, 3])
    return 30.0 * (real_loss + imag_loss) + 70.0 * mag_loss + sisnr


# ----------------------------- pure-JAX reference -----------------------------
def _reference_loss(pred_stft, true_stft):
    """Mirrors the PyTorch module with jnp.fft.irfft + scatter overlap-add."""
    window = jnp.asarray(_hann_sqrt_window(WIN_LENGTH))

    def istft(spec):
        B, F, T, _ = spec.shape
        x = spec[..., 0] + 1j * spec[..., 1]                       # (B, F, T)
        frames = jnp.fft.irfft(x, n=N_FFT, axis=1)                 # (B, n_fft, T)
        frames = frames * window[None, :, None]
        total = N_FFT + HOP_LENGTH * (T - 1)
        pos = (np.arange(N_FFT)[:, None]
               + HOP_LENGTH * np.arange(T)[None, :]).reshape(-1)
        sig = jnp.zeros((B, total), jnp.float32).at[:, pos].add(frames.reshape(B, -1))
        w2 = _hann_sqrt_window(WIN_LENGTH).astype(np.float64) ** 2
        env = np.zeros(total, np.float64)
        for t in range(T):
            env[t * HOP_LENGTH: t * HOP_LENGTH + N_FFT] += w2
        start, length = N_FFT // 2, HOP_LENGTH * (T - 1)
        env_kept = jnp.asarray(env[start:start + length].astype(np.float32))
        return sig[:, start:start + length] / env_kept[None, :]

    y_pred = istft(pred_stft)
    y_true = istft(true_stft)

    pr, pi = pred_stft[..., 0], pred_stft[..., 1]
    tr, ti = true_stft[..., 0], true_stft[..., 1]
    pmag = jnp.sqrt(pr ** 2 + pi ** 2 + 1e-12)
    tmag = jnp.sqrt(tr ** 2 + ti ** 2 + 1e-12)
    real_loss = jnp.mean((pr / pmag ** 0.7 - tr / tmag ** 0.7) ** 2)
    imag_loss = jnp.mean((pi / pmag ** 0.7 - ti / tmag ** 0.7) ** 2)
    mag_loss = jnp.mean((pmag ** 0.3 - tmag ** 0.3) ** 2)

    dot = jnp.sum(y_true * y_pred, axis=-1, keepdims=True)
    s = dot * y_true / (jnp.sum(jnp.square(y_true), axis=-1, keepdims=True) + 1e-8)
    sisnr = -jnp.mean(jnp.log10(
        jnp.sum(jnp.square(s), axis=-1, keepdims=True)
        / jnp.sum(jnp.square(y_pred - s), axis=-1, keepdims=True) + 1e-8))
    return 30.0 * (real_loss + imag_loss) + 70.0 * mag_loss + sisnr


# ----------------------------- Demo -------------------------------------------
if __name__ == "__main__":
    key = jax.random.PRNGKey(0)
    B, F, T = 2, N_FREQ, 9            # -> signal length = hop * (T - 1) = 256
    k1, k2 = jax.random.split(key)
    pred_stft = jax.random.normal(k1, (B, F, T, 2), dtype=jnp.float32)
    true_stft = jax.random.normal(k2, (B, F, T, 2), dtype=jnp.float32)

    loss = jax.jit(loss_hybrid)(pred_stft, true_stft)
    jax.block_until_ready(loss)
    assert loss.shape == () and bool(jnp.isfinite(loss)), loss

    ref = jax.jit(_reference_loss)(pred_stft, true_stft)
    jax.block_until_ready(ref)
    assert abs(float(loss) - float(ref)) <= 1e-3 * abs(float(ref)) + 1e-3, (loss, ref)

    print("KERNEL_OK")
</pallas_src>

<mosaic_0001>
module attributes {stable_mosaic.version = 11 : i64} {
  func.func @_loss_hybrid_kernel(%arg0: i32, %arg1: memref<1x33x9xf32, #tpu.memory_space<vmem>>, %arg2: memref<1x33x9xf32, #tpu.memory_space<vmem>>, %arg3: memref<1x33x9xf32, #tpu.memory_space<vmem>>, %arg4: memref<1x33x9xf32, #tpu.memory_space<vmem>>, %arg5: memref<64x33xf32, #tpu.memory_space<vmem>>, %arg6: memref<64x33xf32, #tpu.memory_space<vmem>>, %arg7: memref<1x1x128xf32, #tpu.memory_space<vmem>>) attributes {dimension_semantics = [#tpu.dimension_semantics<parallel>], iteration_bounds = array<i64: 2>, scalar_prefetch = 0 : i64, scratch_operands = 0 : i64, tpu.core_type = #tpu.core_type<tc>, window_params = [{transform_indices = @transform_0, window_bounds = array<i64: 1, 33, 9>}, {transform_indices = @transform_1, window_bounds = array<i64: 1, 33, 9>}, {transform_indices = @transform_2, window_bounds = array<i64: 1, 33, 9>}, {transform_indices = @transform_3, window_bounds = array<i64: 1, 33, 9>}, {pipeline_mode = #tpu.pipeline_mode<synchronous>, transform_indices = @transform_4, window_bounds = array<i64: 64, 33>}, {pipeline_mode = #tpu.pipeline_mode<synchronous>, transform_indices = @transform_5, window_bounds = array<i64: 64, 33>}, {transform_indices = @transform_6, window_bounds = array<i64: 1, 1, 128>}]} {
    %c0 = arith.constant 0 : index
    %c0_0 = arith.constant 0 : index
    %c0_1 = arith.constant 0 : index
    %0 = vector.load %arg1[%c0, %c0_0, %c0_1] : memref<1x33x9xf32, #tpu.memory_space<vmem>>, vector<1x33x9xf32>
    %1 = vector.shape_cast %0 : vector<1x33x9xf32> to vector<33x9xf32>
    %c0_2 = arith.constant 0 : index
    %c0_3 = arith.constant 0 : index
    %c0_4 = arith.constant 0 : index
    %2 = vector.load %arg2[%c0_2, %c0_3, %c0_4] : memref<1x33x9xf32, #tpu.memory_space<vmem>>, vector<1x33x9xf32>
    %3 = vector.shape_cast %2 : vector<1x33x9xf32> to vector<33x9xf32>
    %c0_5 = arith.constant 0 : index
    %c0_6 = arith.constant 0 : index
    %c0_7 = arith.constant 0 : index
    %4 = vector.load %arg3[%c0_5, %c0_6, %c0_7] : memref<1x33x9xf32, #tpu.memory_space<vmem>>, vector<1x33x9xf32>
    %5 = vector.shape_cast %4 : vector<1x33x9xf32> to vector<33x9xf32>
    %c0_8 = arith.constant 0 : index
    %c0_9 = arith.constant 0 : index
    %c0_10 = arith.constant 0 : index
    %6 = vector.load %arg4[%c0_8, %c0_9, %c0_10] : memref<1x33x9xf32, #tpu.memory_space<vmem>>, vector<1x33x9xf32>
    %7 = vector.shape_cast %6 : vector<1x33x9xf32> to vector<33x9xf32>
    %8 = arith.mulf %1, %1 : vector<33x9xf32>
    %9 = arith.mulf %3, %3 : vector<33x9xf32>
    %10 = arith.addf %8, %9 : vector<33x9xf32>
    %cst = arith.constant 9.99999996E-13 : f32
    %11 = vector.broadcast %cst : f32 to vector<33x9xf32>
    %12 = arith.addf %10, %11 : vector<33x9xf32>
    %13 = math.sqrt %12 : vector<33x9xf32>
    %14 = arith.mulf %5, %5 : vector<33x9xf32>
    %15 = arith.mulf %7, %7 : vector<33x9xf32>
    %16 = arith.addf %14, %15 : vector<33x9xf32>
    %cst_11 = arith.constant 9.99999996E-13 : f32
    %17 = vector.broadcast %cst_11 : f32 to vector<33x9xf32>
    %18 = arith.addf %16, %17 : vector<33x9xf32>
    %19 = math.sqrt %18 : vector<33x9xf32>
    %20 = math.log %13 : vector<33x9xf32>
    %cst_12 = arith.constant -0.699999988 : f32
    %21 = vector.broadcast %cst_12 : f32 to vector<33x9xf32>
    %22 = arith.mulf %21, %20 : vector<33x9xf32>
    %23 = math.exp %22 : vector<33x9xf32>
    %24 = math.log %19 : vector<33x9xf32>
    %cst_13 = arith.constant -0.699999988 : f32
    %25 = vector.broadcast %cst_13 : f32 to vector<33x9xf32>
    %26 = arith.mulf %25, %24 : vector<33x9xf32>
    %27 = math.exp %26 : vector<33x9xf32>
    %28 = arith.mulf %1, %23 : vector<33x9xf32>
    %29 = arith.mulf %5, %27 : vector<33x9xf32>
    %30 = arith.subf %28, %29 : vector<33x9xf32>
    %31 = arith.mulf %3, %23 : vector<33x9xf32>
    %32 = arith.mulf %7, %27 : vector<33x9xf32>
    %33 = arith.subf %31, %32 : vector<33x9xf32>
    %34 = arith.mulf %13, %23 : vector<33x9xf32>
    %35 = arith.mulf %19, %27 : vector<33x9xf32>
    %36 = arith.subf %34, %35 : vector<33x9xf32>
    %37 = arith.mulf %30, %30 : vector<33x9xf32>
    %38 = vector.shape_cast %37 : vector<33x9xf32> to vector<1x33x9xf32>
    %cst_14 = arith.constant dense<0.000000e+00> : vector<1xf32>
    %39 = vector.multi_reduction <add>, %38, %cst_14 [1, 2] : vector<1x33x9xf32> to vector<1xf32>
    %40 = vector.shape_cast %39 : vector<1xf32> to vector<1x1x1xf32>
    %41 = vector.extract %40[0, 0, 0] : f32 from vector<1x1x1xf32>
    %42 = vector.broadcast %41 : f32 to vector<1x1xf32>
    %43 = arith.mulf %33, %33 : vector<33x9xf32>
    %44 = vector.shape_cast %43 : vector<33x9xf32> to vector<1x33x9xf32>
    %cst_15 = arith.constant dense<0.000000e+00> : vector<1xf32>
    %45 = vector.multi_reduction <add>, %44, %cst_15 [1, 2] : vector<1x33x9xf32> to vector<1xf32>
    %46 = vector.shape_cast %45 : vector<1xf32> to vector<1x1x1xf32>
    %47 = vector.extract %46[0, 0, 0] : f32 from vector<1x1x1xf32>
    %48 = vector.broadcast %47 : f32 to vector<1x1xf32>
    %49 = arith.mulf %36, %36 : vector<33x9xf32>
    %50 = vector.shape_cast %49 : vector<33x9xf32> to vector<1x33x9xf32>
    %cst_16 = arith.constant dense<0.000000e+00> : vector<1xf32>
    %51 = vector.multi_reduction <add>, %50, %cst_16 [1, 2] : vector<1x33x9xf32> to vector<1xf32>
    %52 = vector.shape_cast %51 : vector<1xf32> to vector<1x1x1xf32>
    %53 = vector.extract %52[0, 0, 0] : f32 from vector<1x1x1xf32>
    %54 = vector.broadcast %53 : f32 to vector<1x1xf32>
    %c0_17 = arith.constant 0 : index
    %c0_18 = arith.constant 0 : index
    %55 = vector.load %arg5[%c0_17, %c0_18] : memref<64x33xf32, #tpu.memory_space<vmem>>, vector<64x33xf32>
    %c0_19 = arith.constant 0 : index
    %c0_20 = arith.constant 0 : index
    %56 = vector.load %arg6[%c0_19, %c0_20] : memref<64x33xf32, #tpu.memory_space<vmem>>, vector<64x33xf32>
    %cst_21 = arith.constant dense<0.000000e+00> : vector<64x9xf32>
    %57 = tpu.matmul %55, %1, %cst_21 {dimension_numbers = #tpu.dot_dimension_numbers<[1], [0], [0], [1], [0, 0, 1, 1], [], []>} : vector<64x33xf32>, vector<33x9xf32>, vector<64x9xf32> -> vector<64x9xf32>
    %cst_22 = arith.constant dense<0.000000e+00> : vector<64x9xf32>
    %58 = tpu.matmul %56, %3, %cst_22 {dimension_numbers = #tpu.dot_dimension_numbers<[1], [0], [0], [1], [0, 0, 1, 1], [], []>} : vector<64x33xf32>, vector<33x9xf32>, vector<64x9xf32> -> vector<64x9xf32>
    %59 = arith.addf %57, %58 : vector<64x9xf32>
    %cst_23 = arith.constant dense<0.000000e+00> : vector<64x9xf32>
    %60 = tpu.matmul %55, %5, %cst_23 {dimension_numbers = #tpu.dot_dimension_numbers<[1], [0], [0], [1], [0, 0, 1, 1], [], []>} : vector<64x33xf32>, vector<33x9xf32>, vector<64x9xf32> -> vector<64x9xf32>
    %cst_24 = arith.constant dense<0.000000e+00> : vector<64x9xf32>
    %61 = tpu.matmul %56, %7, %cst_24 {dimension_numbers = #tpu.dot_dimension_numbers<[1], [0], [0], [1], [0, 0, 1, 1], [], []>} : vector<64x33xf32>, vector<33x9xf32>, vector<64x9xf32> -> vector<64x9xf32>
    %62 = arith.addf %60, %61 : vector<64x9xf32>
    %63 = vector.extract_strided_slice %59 {offsets = [0, 1], sizes = [32, 8], strides = [1, 1]} : vector<64x9xf32> to vector<32x8xf32>
    %64 = vector.extract_strided_slice %59 {offsets = [32, 0], sizes = [32, 8], strides = [1, 1]} : vector<64x9xf32> to vector<32x8xf32>
    %65 = arith.addf %63, %64 : vector<32x8xf32>
    %66 = vector.extract_strided_slice %62 {offsets = [0, 1], sizes = [32, 8], strides = [1, 1]} : vector<64x9xf32> to vector<32x8xf32>
    %67 = vector.extract_strided_slice %62 {offsets = [32, 0], sizes = [32, 8], strides = [1, 1]} : vector<64x9xf32> to vector<32x8xf32>
    %68 = arith.addf %66, %67 : vector<32x8xf32>
    %69 = arith.mulf %68, %65 : vector<32x8xf32>
    %70 = vector.shape_cast %69 : vector<32x8xf32> to vector<1x32x8xf32>
    %cst_25 = arith.constant dense<0.000000e+00> : vector<1xf32>
    %71 = vector.multi_reduction <add>, %70, %cst_25 [1, 2] : vector<1x32x8xf32> to vector<1xf32>
    %72 = vector.shape_cast %71 : vector<1xf32> to vector<1x1x1xf32>
    %73 = vector.extract %72[0, 0, 0] : f32 from vector<1x1x1xf32>
    %74 = vector.broadcast %73 : f32 to vector<1x1xf32>
    %75 = arith.mulf %68, %68 : vector<32x8xf32>
    %76 = vector.shape_cast %75 : vector<32x8xf32> to vector<1x32x8xf32>
    %cst_26 = arith.constant dense<0.000000e+00> : vector<1xf32>
    %77 = vector.multi_reduction <add>, %76, %cst_26 [1, 2] : vector<1x32x8xf32> to vector<1xf32>
    %78 = vector.shape_cast %77 : vector<1xf32> to vector<1x1x1xf32>
    %79 = vector.extract %78[0, 0, 0] : f32 from vector<1x1x1xf32>
    %80 = vector.broadcast %79 : f32 to vector<1x1xf32>
    %cst_27 = arith.constant 9.99999993E-9 : f32
    %81 = vector.broadcast %cst_27 : f32 to vector<1x1xf32>
    %82 = arith.addf %80, %81 : vector<1x1xf32>
    %83 = arith.divf %74, %82 : vector<1x1xf32>
    %84 = vector.broadcast %83 : vector<1x1xf32> to vector<32x8xf32>
    %85 = arith.mulf %84, %68 : vector<32x8xf32>
    %86 = arith.subf %65, %85 : vector<32x8xf32>
    %87 = arith.mulf %85, %85 : vector<32x8xf32>
    %88 = vector.shape_cast %87 : vector<32x8xf32> to vector<1x32x8xf32>
    %cst_28 = arith.constant dense<0.000000e+00> : vector<1xf32>
    %89 = vector.multi_reduction <add>, %88, %cst_28 [1, 2] : vector<1x32x8xf32> to vector<1xf32>
    %90 = vector.shape_cast %89 : vector<1xf32> to vector<1x1x1xf32>
    %91 = vector.extract %90[0, 0, 0] : f32 from vector<1x1x1xf32>
    %92 = vector.broadcast %91 : f32 to vector<1x1xf32>
    %93 = arith.mulf %86, %86 : vector<32x8xf32>
    %94 = vector.shape_cast %93 : vector<32x8xf32> to vector<1x32x8xf32>
    %cst_29 = arith.constant dense<0.000000e+00> : vector<1xf32>
    %95 = vector.multi_reduction <add>, %94, %cst_29 [1, 2] : vector<1x32x8xf32> to vector<1xf32>
    %96 = vector.shape_cast %95 : vector<1xf32> to vector<1x1x1xf32>
    %97 = vector.extract %96[0, 0, 0] : f32 from vector<1x1x1xf32>
    %98 = vector.broadcast %97 : f32 to vector<1x1xf32>
    %99 = arith.divf %92, %98 : vector<1x1xf32>
    %cst_30 = arith.constant 9.99999993E-9 : f32
    %100 = vector.broadcast %cst_30 : f32 to vector<1x1xf32>
    %101 = arith.addf %99, %100 : vector<1x1xf32>
    %102 = math.log %101 : vector<1x1xf32>
    %cst_31 = arith.constant 0.000000e+00 : f32
    %103 = vector.broadcast %cst_31 : f32 to vector<1x1xf32>
    %104 = arith.subf %103, %102 : vector<1x1xf32>
    %cst_32 = arith.constant 0.434294492 : f32
    %105 = vector.broadcast %cst_32 : f32 to vector<1x1xf32>
    %106 = arith.mulf %104, %105 : vector<1x1xf32>
    %107 = tpu.iota {dimensions = array<i32: 1>} : vector<1x128xi32>
    %c0_i32 = arith.constant 0 : i32
    %108 = vector.broadcast %c0_i32 : i32 to vector<1x128xi32>
    %109 = arith.cmpi eq, %107, %108 : vector<1x128xi32>
    %c1_i32 = arith.constant 1 : i32
    %110 = vector.broadcast %c1_i32 : i32 to vector<1x128xi32>
    %111 = arith.cmpi eq, %107, %110 : vector<1x128xi32>
    %c2_i32 = arith.constant 2 : i32
    %112 = vector.broadcast %c2_i32 : i32 to vector<1x128xi32>
    %113 = arith.cmpi eq, %107, %112 : vector<1x128xi32>
    %c3_i32 = arith.constant 3 : i32
    %114 = vector.broadcast %c3_i32 : i32 to vector<1x128xi32>
    %115 = arith.cmpi eq, %107, %114 : vector<1x128xi32>
    %cst_33 = arith.constant 0.000000e+00 : f32
    %116 = vector.shape_cast %106 : vector<1x1xf32> to vector<1x1xf32>
    %117 = vector.broadcast %116 : vector<1x1xf32> to vector<1x128xf32>
    %118 = vector.broadcast %cst_33 : f32 to vector<1x128xf32>
    %119 = arith.select %115, %117, %118 : vector<1x128xi1>, vector<1x128xf32>
    %120 = vector.shape_cast %54 : vector<1x1xf32> to vector<1x1xf32>
    %121 = vector.broadcast %120 : vector<1x1xf32> to vector<1x128xf32>
    %122 = arith.select %113, %121, %119 : vector<1x128xi1>, vector<1x128xf32>
    %123 = vector.shape_cast %48 : vector<1x1xf32> to vector<1x1xf32>
    %124 = vector.broadcast %123 : vector<1x1xf32> to vector<1x128xf32>
    %125 = arith.select %111, %124, %122 : vector<1x128xi1>, vector<1x128xf32>
    %126 = vector.shape_cast %42 : vector<1x1xf32> to vector<1x1xf32>
    %127 = vector.broadcast %126 : vector<1x1xf32> to vector<1x128xf32>
    %128 = arith.select %109, %127, %125 : vector<1x128xi1>, vector<1x128xf32>
    %c0_34 = arith.constant 0 : index
    %c0_35 = arith.constant 0 : index
    %c0_36 = arith.constant 0 : index
    %129 = vector.load %arg7[%c0_34, %c0_35, %c0_36] : memref<1x1x128xf32, #tpu.memory_space<vmem>>, vector<1x1x128xf32>
    %130 = vector.shape_cast %129 : vector<1x1x128xf32> to vector<1x128xf32>
    %131 = vector.shape_cast %128 : vector<1x128xf32> to vector<1x1x128xf32>
    tpu.vector_store %arg7[%c0_34, %c0_35, %c0_36], %131 {strides = array<i32>} : memref<1x1x128xf32, #tpu.memory_space<vmem>>, vector<1x1x128xf32>,
    return
  }
  func.func @transform_0(%arg0: i32) -> (i32, i32, i32) {
    %c0_i32 = arith.constant 0 : i32
    %c0_i32_0 = arith.constant 0 : i32
    %c0_i32_1 = arith.constant 0 : i32
    return %arg0, %c0_i32, %c0_i32_0 : i32, i32, i32
  }
  func.func @transform_1(%arg0: i32) -> (i32, i32, i32) {
    %c0_i32 = arith.constant 0 : i32
    %c0_i32_0 = arith.constant 0 : i32
    %c0_i32_1 = arith.constant 0 : i32
    return %arg0, %c0_i32, %c0_i32_0 : i32, i32, i32
  }
  func.func @transform_2(%arg0: i32) -> (i32, i32, i32) {
    %c0_i32 = arith.constant 0 : i32
    %c0_i32_0 = arith.constant 0 : i32
    %c0_i32_1 = arith.constant 0 : i32
    return %arg0, %c0_i32, %c0_i32_0 : i32, i32, i32
  }
  func.func @transform_3(%arg0: i32) -> (i32, i32, i32) {
    %c0_i32 = arith.constant 0 : i32
    %c0_i32_0 = arith.constant 0 : i32
    %c0_i32_1 = arith.constant 0 : i32
    return %arg0, %c0_i32, %c0_i32_0 : i32, i32, i32
  }
  func.func @transform_4(%arg0: i32) -> (i32, i32) {
    %c0_i32 = arith.constant 0 : i32
    %c0_i32_0 = arith.constant 0 : i32
    %c0_i32_1 = arith.constant 0 : i32
    return %c0_i32, %c0_i32_0 : i32, i32
  }
  func.func @transform_5(%arg0: i32) -> (i32, i32) {
    %c0_i32 = arith.constant 0 : i32
    %c0_i32_0 = arith.constant 0 : i32
    %c0_i32_1 = arith.constant 0 : i32
    return %c0_i32, %c0_i32_0 : i32, i32
  }
  func.func @transform_6(%arg0: i32) -> (i32, i32, i32) {
    %c0_i32 = arith.constant 0 : i32
    %c0_i32_0 = arith.constant 0 : i32
    %c0_i32_1 = arith.constant 0 : i32
    return %arg0, %c0_i32, %c0_i32_0 : i32, i32, i32
  }
}

</mosaic_0001>

<bundles_post_ra>
// kernel: loss_hybrid.1
= control target key start
LH: loop header
LB: loop body
LE: loop exit
PB: predicated region body
PF: predicated region fallthrough
CT: control target
= control target key end

     0   :  { %s1409_s21 = smov 0   ;;  %s1980_s0 = inlined_call_operand.vmem [shape: f32[2,33,9], index: 0, kind: input, shape index: {}]   ;;  %s1981_s1 = inlined_call_operand.vmem [shape: f32[2,33,9], index: 1, kind: input, shape index: {}]   ;;  %s1982_s2 = inlined_call_operand.vmem [shape: f32[2,33,9], index: 2, kind: input, shape index: {}]   ;;  %s1983_s3 = inlined_call_operand.vmem [shape: f32[2,33,9], index: 3, kind: input, shape index: {}]   ;;  %s1984_s4 = inlined_call_operand.vmem [shape: f32[64,33], index: 4, kind: input, shape index: {}]   ;;  %s1985_s5 = inlined_call_operand.vmem [shape: f32[64,33], index: 5, kind: input, shape index: {}]   ;;  %s1986_s6 = inlined_call_operand.vmem [shape: f32[2,1,128], index: 6, kind: output, shape index: {}]  }
   0x1 LB: > { %s1226_s22 = sadd.s32 4294967295, %s1370_s21   ;;  %p1230_p0 = scmp.ge.s32.totalorder %s1370_s21, 1  ;;  %s1370_s21 = sphi %s1409_s21, %s16_s21  }
   0x2   : > { %p242_p1 = scmp.lt.s32.totalorder %s1370_s21, 3 }
   0x4   : > { %p243_p2 = pnand %p1230_p0, %p242_p1 }
   0x6   : > { %246 = sbr.rel (%p243_p2) target bundleno = 1014 (0x3f6), region = 44 }
   0xb   : > { %p285_p3 = scmp.lt.s32.totalorder %s1226_s22, 1  ;;  %vm695_vm0 = vcmask 1040384   ;;  %v662_v20 = vld [vmem:[%s1985_s5] sm:$0xff]  ;;  %vm670_vm1 = vcmask 269312   ;;  %v663_v22 = vld [vmem:[%s1985_s5 + $0x8] sm:$0xff]  ;;  %v664_v24 = vld [vmem:[%s1985_s5 + $0x10] sm:$0xff] }
   0xc   : > { %v654_v21 = vld [vmem:[%s1984_s4] sm:$0xff]  ;;  %v655_v23 = vld [vmem:[%s1984_s4 + $0x8] sm:$0xff]  ;;  %v656_v25 = vld [vmem:[%s1984_s4 + $0x10] sm:$0xff]  ;;  %s1372_s24 = smov 1   ;;  %s1373_s25 = smov 127  }
   0xd   : > { %s2024_s22 = smov (!%p285_p3, %s1226_s22), 1  ;;  %v665_v26 = vld [vmem:[%s1985_s5 + $0x18] sm:$0xff]  ;;  %v666_v28 = vld [vmem:[%s1985_s5 + $0x20] sm:$0xff]  ;;  %v667_v30 = vld [vmem:[%s1985_s5 + $0x28] sm:$0xff] }
   0xe   : > { %s1273_s23 = smul.u32 40, %s2024_s22  ;;  %v657_v27 = vld [vmem:[%s1984_s4 + $0x18] sm:$0xff]  ;;  %v658_v29 = vld [vmem:[%s1984_s4 + $0x20] sm:$0xff]  ;;  %v659_v31 = vld [vmem:[%s1984_s4 + $0x28] sm:$0xff] }
   0xf   : > { %v668_v32 = vld [vmem:[%s1985_s5 + $0x30] sm:$0xff]  ;;  %v669_v34 = vld [vmem:[%s1985_s5 + $0x38] sm:$0xff] }
  0x10   : > { %s1423_s26 = scalar_lea.vmem %s1981_s1, %s1273_s23  ;;  %s1428_s29 = scalar_lea.vmem %s1980_s0, %s1273_s23  ;;  %v660_v33 = vld [vmem:[%s1984_s4 + $0x30] sm:$0xff]  ;;  %v661_v35 = vld [vmem:[%s1984_s4 + $0x38] sm:$0xff] }
  0x11   : > { %v1431_v0 = vld [vmem:[%s1423_s26 + $0x20] sm:$0x1]  ;;  %s1439_s8 = scalar_lea.vmem %s1983_s3, %s1273_s23  ;;  %s1444_s11 = scalar_lea.vmem %s1982_s2, %s1273_s23  ;;  %v1447_v2 = vld [vmem:[%s1423_s26 + $0x18] sm:$0xff]  ;;  %v1469_v8 = vld [vmem:[%s1423_s26 + $0x10] sm:$0xff] }
  0x12   : > { %1999 = vst [vmem:[#allocation2_spill] sm:$0xff] %v1431_v0  ;;  %v1434_v1 = vld [vmem:[%s1428_s29 + $0x20] sm:$0x1]  ;;  %1235 = vmatpush.msk.msra.mxu0 %vm695_vm0, %v1431_v0  ;;  %v1458_v5 = vld [vmem:[%s1428_s29 + $0x18] sm:$0xff]  ;;  %v1474_v9 = vld [vmem:[%s1428_s29 + $0x10] sm:$0xff] }
  0x13   : > { %2000 = vst [vmem:[#allocation3_spill] sm:$0xff] %v1447_v2  ;;  %1244 = vmatpush.msk.msra.mxu1 %vm695_vm0, %v1434_v1  ;;  %v1452_v3 = vld [vmem:[%s1439_s8 + $0x20] sm:$0x1]  ;;  %v1463_v6 = vld [vmem:[%s1439_s8 + $0x18] sm:$0xff]  ;;  %v1477_v10 = vld [vmem:[%s1439_s8 + $0x10] sm:$0xff] }
  0x14   : > { %2001 = vst [vmem:[#allocation4_spill] sm:$0xff] %v1452_v3  ;;  %v1455_v4 = vld [vmem:[%s1444_s11 + $0x20] sm:$0x1]  ;;  %1253 = vmatpush.msk.msra.mxu2 %vm695_vm0, %v1452_v3  ;;  %v1466_v7 = vld [vmem:[%s1444_s11 + $0x18] sm:$0xff]  ;;  %711 = vmatpush.msra.mxu0 %v1447_v2  ;;  %v1480_v11 = vld [vmem:[%s1444_s11 + $0x10] sm:$0xff] }
  0x15   : > { %2002 = vst [vmem:[#allocation5_spill] sm:$0xff] %v1455_v4  ;;  %1262 = vmatpush.msk.msra.mxu3 %vm695_vm0, %v1455_v4  ;;  %779 = vmatpush.msra.mxu1 %v1458_v5  ;;  %v1485_v12 = vld [vmem:[%s1423_s26 + $0x8] sm:$0xff]  ;;  %v1501_v16 = vld [vmem:[%s1423_s26] sm:$0xff] }
  0x16   : > { %2003 = vst [vmem:[#allocation6_spill] sm:$0xff] %v1463_v6  ;;  %823 = vmatpush.msra.mxu2 %v1463_v6  ;;  %v1488_v13 = vld [vmem:[%s1428_s29 + $0x8] sm:$0xff]  ;;  %712 = vmatpush.msra.mxu0 %v1469_v8  ;;  %v1504_v17 = vld [vmem:[%s1428_s29] sm:$0xff] }
  0x17   : > { %867 = vmatpush.msra.mxu3 %v1466_v7  ;;  %780 = vmatpush.msra.mxu1 %v1474_v9  ;;  %v1493_v14 = vld [vmem:[%s1439_s8 + $0x8] sm:$0xff]  ;;  %v1509_v18 = vld [vmem:[%s1439_s8] sm:$0xff] }
  0x18   : > { %v1496_v15 = vld [vmem:[%s1444_s11 + $0x8] sm:$0xff]  ;;  %824 = vmatpush.msra.mxu2 %v1477_v10  ;;  %713 = vmatpush.msra.mxu0 %v1485_v12  ;;  %v1512_v19 = vld [vmem:[%s1444_s11] sm:$0xff]  ;;  %s307_s11 = scalar_lea.vmem %s1986_s6, %s2024_s22 }
  0x19   : > { %868 = vmatpush.msra.mxu3 %v1480_v11  ;;  %781 = vmatpush.msra.mxu1 %v1488_v13 }
  0x1a   : > { %825 = vmatpush.msra.mxu2 %v1493_v14  ;;  %714 = vmatpush.msra.mxu0 %v1501_v16 }
  0x1b   : > { %869 = vmatpush.msra.mxu3 %v1496_v15  ;;  %782 = vmatpush.msra.mxu1 %v1504_v17 }
  0x1c   : > { %826 = vmatpush.msra.mxu2 %v1509_v18  ;;  %1236 = vmatmul.msk.f32.vlgmr.msra.gmra.mxu0 %vm670_vm1, %v662_v20 }
  0x1d   : > { %870 = vmatpush.msra.mxu3 %v1512_v19  ;;  %1245 = vmatmul.msk.f32.vlgmr.msra.gmra.mxu1 %vm670_vm1, %v654_v21 }
  0x1e   : > { %1254 = vmatmul.msk.f32.vlgmr.msra.gmra.mxu2 %vm670_vm1, %v662_v20  ;;  %1263 = vmatmul.msk.f32.vlgmr.msra.gmra.mxu3 %vm670_vm1, %v654_v21 }
  0x24   : > { %1237 = vmatmul.msk.f32.gmra.mxu0 %vm670_vm1, %v663_v22 }
  0x25   : > { %1246 = vmatmul.msk.f32.gmra.mxu1 %vm670_vm1, %v655_v23 }
  0x26   : > { %1255 = vmatmul.msk.f32.gmra.mxu2 %vm670_vm1, %v663_v22  ;;  %1264 = vmatmul.msk.f32.gmra.mxu3 %vm670_vm1, %v655_v23 }
  0x2c   : > { %1238 = vmatmul.msk.f32.gmra.mxu0 %vm670_vm1, %v664_v24 }
  0x2d   : > { %1247 = vmatmul.msk.f32.gmra.mxu1 %vm670_vm1, %v656_v25 }
  0x2e   : > { %1256 = vmatmul.msk.f32.gmra.mxu2 %vm670_vm1, %v664_v24  ;;  %1265 = vmatmul.msk.f32.gmra.mxu3 %vm670_vm1, %v656_v25 }
  0x34   : > { %1239 = vmatmul.msk.f32.gmra.mxu0 %vm670_vm1, %v665_v26 }
  0x35   : > { %1248 = vmatmul.msk.f32.gmra.mxu1 %vm670_vm1, %v657_v27 }
  0x36   : > { %1257 = vmatmul.msk.f32.gmra.mxu2 %vm670_vm1, %v665_v26  ;;  %1266 = vmatmul.msk.f32.gmra.mxu3 %vm670_vm1, %v657_v27 }
  0x3c   : > { %1240 = vmatmul.msk.f32.gmra.mxu0 %vm670_vm1, %v666_v28 }
  0x3d   : > { %1249 = vmatmul.msk.f32.gmra.mxu1 %vm670_vm1, %v658_v29 }
  0x3e   : > { %1258 = vmatmul.msk.f32.gmra.mxu2 %vm670_vm1, %v666_v28  ;;  %1267 = vmatmul.msk.f32.gmra.mxu3 %vm670_vm1, %v658_v29 }
  0x44   : > { %1241 = vmatmul.msk.f32.gmra.mxu0 %vm670_vm1, %v667_v30 }
  0x45   : > { %1250 = vmatmul.msk.f32.gmra.mxu1 %vm670_vm1, %v659_v31 }
  0x46   : > { %1259 = vmatmul.msk.f32.gmra.mxu2 %vm670_vm1, %v667_v30  ;;  %1268 = vmatmul.msk.f32.gmra.mxu3 %vm670_vm1, %v659_v31 }
  0x4c   : > { %1242 = vmatmul.msk.f32.gmra.mxu0 %vm670_vm1, %v668_v32 }
  0x4d   : > { %1251 = vmatmul.msk.f32.gmra.mxu1 %vm670_vm1, %v660_v33 }
  0x4e   : > { %1260 = vmatmul.msk.f32.gmra.mxu2 %vm670_vm1, %v668_v32  ;;  %1269 = vmatmul.msk.f32.gmra.mxu3 %vm670_vm1, %v660_v33 }
  0x54   : > { %1243 = vmatmul.msk.f32.gmra.mxu0 %vm670_vm1, %v669_v34 }
  0x55   : > { %1252 = vmatmul.msk.f32.gmra.mxu1 %vm670_vm1, %v661_v35 }
  0x56   : > { %1261 = vmatmul.msk.f32.gmra.mxu2 %vm670_vm1, %v669_v34  ;;  %1270 = vmatmul.msk.f32.gmra.mxu3 %vm670_vm1, %v661_v35 }
  0x99   : > { %v716_v36 = vpop.f32.mrf.mxu0 }
  0x9a   : > { %v784_v37 = vpop.f32.mrf.mxu1 }
  0x9b   : > { %v1600_v38 = vadd.f32 %v784_v37, %v716_v36 }
  0xa1   : > { %v828_v39 = vpop.f32.mrf.mxu2  ;;  %v872_v40 = vpop.f32.mrf.mxu3 }
  0xa2   : > { %v1602_v41 = vadd.f32 %v872_v40, %v828_v39  ;;  %v719_v42 = vpop.f32.mrf.mxu0  ;;  %v787_v43 = vpop.f32.mrf.mxu1 }
  0xa3   : > { %v1604_v44 = vadd.f32 %v787_v43, %v719_v42  ;;  %v337_v43 = vmul.f32 %v1431_v0, %v1431_v0 }
  0xa9   : > { %v831_v45 = vpop.f32.mrf.mxu2  ;;  %v875_v46 = vpop.f32.mrf.mxu3 }
  0xaa   : > { %v1606_v47 = vadd.f32 %v875_v46, %v831_v45  ;;  %v722_v48 = vpop.f32.mrf.mxu0  ;;  %v790_v49 = vpop.f32.mrf.mxu1  ;;  %v332_v45 = vmul.f32 %v1434_v1, %v1434_v1  ;;  %v336_v46 = vmul.f32 %v1447_v2, %v1447_v2 }
  0xab   : > { %v1608_v50 = vadd.f32 %v790_v49, %v722_v48  ;;  %v331_v48 = vmul.f32 %v1458_v5, %v1458_v5  ;;  %v335_v49 = vmul.f32 %v1469_v8, %v1469_v8 }
  0xb1   : > { %v834_v51 = vpop.f32.mrf.mxu2  ;;  %v878_v52 = vpop.f32.mrf.mxu3 }
  0xb2   : > { %v1610_v53 = vadd.f32 %v878_v52, %v834_v51  ;;  %v725_v54 = vpop.f32.mrf.mxu0  ;;  %v793_v55 = vpop.f32.mrf.mxu1  ;;  %v330_v51 = vmul.f32 %v1474_v9, %v1474_v9 }
  0xb3   : > { %v1612_v56 = vadd.f32 %v793_v55, %v725_v54  ;;  %v334_v54 = vmul.f32 %v1485_v12, %v1485_v12  ;;  %v329_v55 = vmul.f32 %v1488_v13, %v1488_v13 }
  0xb9   : > { %v837_v57 = vpop.f32.mrf.mxu2  ;;  %v881_v58 = vpop.f32.mrf.mxu3 }
  0xba   : > { %v1614_v59 = vadd.f32 %v881_v58, %v837_v57  ;;  %v728_v60 = vpop.f32.mrf.mxu0  ;;  %v796_v61 = vpop.f32.mrf.mxu1  ;;  %v342_v57 = vadd.f32 %v337_v43, %v332_v45  ;;  %v417_v58 = vmul.f32 %v1452_v3, %v1452_v3 }
  0xbb   : > { %v797_v62 = vadd.f32 %v796_v61, %v728_v60  ;;  %v414_v60 = vmul.f32 %v1493_v14, %v1493_v14  ;;  %v409_v61 = vmul.f32 %v1496_v15, %v1496_v15 }
  0xbd   : > { %900 = vrot.lane.b32.xlu0 %v797_v62, %s1372_s24  ;;  %v341_v62 = vadd.f32 %v336_v46, %v331_v48 }
  0xc1   : > { %v840_v63 = vpop.f32.mrf.mxu2  ;;  %v884_v20 = vpop.f32.mrf.mxu3 }
  0xc2   : > { %v885_v21 = vadd.f32 %v884_v20, %v840_v63  ;;  %v731_v22 = vpop.f32.mrf.mxu0  ;;  %v799_v23 = vpop.f32.mrf.mxu1  ;;  %v340_v63 = vadd.f32 %v335_v49, %v330_v51  ;;  %v333_v20 = vmul.f32 %v1501_v16, %v1501_v16 }
  0xc3   : > { %v800_v24 = vadd.f32 %v799_v23, %v731_v22  ;;  %v413_v23 = vmul.f32 %v1509_v18, %v1509_v18 }
  0xc4   : > { %920 = vrot.lane.b32.xlu1 %v885_v21, %s1372_s24  ;;  %v328_v21 = vmul.f32 %v1504_v17, %v1504_v17 }
  0xc5   : > { %902 = vrot.lane.b32.xlu0 %v800_v24, %s1372_s24  ;;  %v408_v24 = vmul.f32 %v1512_v19, %v1512_v19 }
  0xc9   : > { %v843_v25 = vpop.f32.mrf.mxu2  ;;  %v887_v26 = vpop.f32.mrf.mxu3 }
  0xca   : > { %v888_v27 = vadd.f32 %v887_v26, %v843_v25  ;;  %v734_v28 = vpop.f32.mrf.mxu0  ;;  %v802_v29 = vpop.f32.mrf.mxu1 }
  0xcb   : > { %v803_v30 = vadd.f32 %v802_v29, %v734_v28  ;;  %v415_v28 = vmul.f32 %v1477_v10, %v1477_v10  ;;  %v410_v29 = vmul.f32 %v1480_v11, %v1480_v11 }
  0xcc   : > { %922 = vrot.lane.b32.xlu1 %v888_v27, %s1372_s24  ;;  %v412_v27 = vmul.f32 %v1455_v4, %v1455_v4 }
  0xcd   : > { %904 = vrot.lane.b32.xlu2 %v803_v30, %s1372_s24  ;;  %v339_v30 = vadd.f32 %v334_v54, %v329_v55  ;;  %v420_v45 = vadd.f32 %v415_v28, %v410_v29 }
  0xce   : > { %v422_v43 = vadd.f32 %v417_v58, %v412_v27 }
  0xcf   : > { %v1676_v46 = vadd.f32 1e-12, %v339_v30 }
  0xd1   : > { %v846_v31 = vpop.f32.mrf.mxu2  ;;  %v890_v32 = vpop.f32.mrf.mxu3  ;;  %vm367_vm3 = vcmp.eq.f32.partialorder %v1676_v46, inf  ;;  %vm369_vm9 = vcmp.eq.f32.partialorder %v1676_v46, 0.0 }
  0xd2   : > { %v737_v33 = vpop.f32.mrf.mxu0  ;;  %v805_v34 = vpop.f32.mrf.mxu1  ;;  %v891_v35 = vadd.f32 %v890_v32, %v846_v31  ;;  %v1660_v31 = vadd.f32 1e-12, %v342_v57  ;;  %v419_v32 = vadd.f32 %v414_v60, %v409_v61  ;;  %v1696_v61 = vadd.f32 1e-12, %v422_v43 }
  0xd3   : > { %v806_v36 = vadd.f32 %v805_v34, %v737_v33  ;;  %v1666_v33 = vadd.f32 1e-12, %v341_v62  ;;  %v416_v34 = vmul.f32 %v1463_v6, %v1463_v6 }
  0xd4   : > { %1298 = vrsqrt.f32 %v1660_v31  ;;  %v1679_v49 = vadd.f32 1e-12, %v419_v32  ;;  %vm403_vm6 = vcmp.eq.f32.partialorder %v1660_v31, inf  ;;  %vm483_vm8 = vcmp.eq.f32.partialorder %v1696_v61, inf }
  0xd5   : > { %924 = vrot.lane.b32.xlu2 %v891_v35, %s1372_s24  ;;  %906 = vrot.lane.b32.xlu0 %v806_v36, %s1372_s24  ;;  %v411_v35 = vmul.f32 %v1466_v7, %v1466_v7  ;;  %v338_v36 = vadd.f32 %v333_v20, %v328_v21  ;;  %1300 = vrsqrt.f32 %v1666_v33  ;;  %vm391_vm2 = vcmp.eq.f32.partialorder %v1666_v33, inf }
  0xd6   : > { %vm447_vm5 = vcmp.eq.f32.partialorder %v1679_v49, inf  ;;  %vm449_vm11 = vcmp.eq.f32.partialorder %v1679_v49, 0.0  ;;  %vm393_vm1 = vcmp.eq.f32.partialorder %v1666_v33, 0.0 }
  0xd7   : > { %v1685_v54 = vadd.f32 1e-12, %v338_v36 }
  0xd9   : > { %v849_v37 = vpop.f32.mrf.mxu2  ;;  %v893_v39 = vpop.f32.mrf.mxu3  ;;  %vm355_vm7 = vcmp.eq.f32.partialorder %v1685_v54, inf  ;;  %vm357_vm13 = vcmp.eq.f32.partialorder %v1685_v54, 0.0 }
  0xda   : > { %v894_v40 = vadd.f32 %v893_v39, %v849_v37  ;;  %v1672_v39 = vadd.f32 1e-12, %v340_v63 }
  0xdc   : > { %926 = vrot.lane.b32.xlu1 %v894_v40, %s1372_s24  ;;  %v418_v40 = vadd.f32 %v413_v23, %v408_v24  ;;  %1302 = vrsqrt.f32 %v1672_v39  ;;  %vm379_vm4 = vcmp.eq.f32.partialorder %v1672_v39, inf  ;;  %vm381_vm15 = vcmp.eq.f32.partialorder %v1672_v39, 0.0 }
  0xdd   : > { %1304 = vrsqrt.f32 %v1676_v46 }
  0xde   : > { %v1688_v57 = vadd.f32 1e-12, %v418_v40  ;;  %1306 = vrsqrt.f32 %v1679_v49 }
  0xdf   : > { %1308 = vrsqrt.f32 %v1685_v54 }
  0xe0   : > { %1310 = vrsqrt.f32 %v1688_v57  ;;  %vm435_vm10 = vcmp.eq.f32.partialorder %v1688_v57, inf  ;;  %vm437_vm14 = vcmp.eq.f32.partialorder %v1688_v57, 0.0 }
  0xe1   : > { %1312 = vrsqrt.f32 %v1696_v61 }
 0x127   : > { %v1616_v42 = vpop.permute.xlu2 %904 }
 0x128   : > { %v1726_v27 = vadd.f32 %v1616_v42, %v1608_v50 }
 0x12a   : > { %2009 = vst [vmem:[#allocation12_spill] sm:$0xff] %v1726_v27 }
 0x12f   : > { %v901_v52 = vpop.permute.xlu0 %900  ;;  %v925_v37 = vpop.permute.xlu2 %924 }
 0x130   : > { %v1649_v25 = vadd.f32 %v901_v52, %v1600_v38  ;;  %v1682_v51 = vadd.f32 %v925_v37, %v1610_v53  ;;  %v421_v52 = vadd.f32 %v416_v34, %v411_v35  ;;  %v1698_v53 = vadd.f32 1e-12, %v420_v45 }
 0x132   : > { %2004 = vst [vmem:[#allocation7_spill] sm:$0xff] %v1649_v25  ;;  %v976_v62 = vmul.f32 %v1682_v51, %v1682_v51  ;;  %v1708_v20 = vadd.f32 1e-12, %v421_v52  ;;  %1314 = vrsqrt.f32 %v1698_v53  ;;  %vm459_vm12 = vcmp.eq.f32.partialorder %v1698_v53, inf }
 0x133   : > { %2006 = vst [vmem:[#allocation9_spill] sm:$0xff] %v1682_v51  ;;  %vm461_vm0 = vcmp.eq.f32.partialorder %v1698_v53, 0.0 }
 0x134   : > { %1316 = vrsqrt.f32 %v1708_v20 }
 0x136   : > { %v921_v22 = vpop.permute.xlu1 %920 }
 0x137   : > { %v1652_v26 = vadd.f32 %v921_v22, %v1602_v41  ;;  %v903_v48 = vpop.permute.xlu0 %902 }
 0x138   : > { %v1691_v58 = vadd.f32 %v903_v48, %v1604_v44 }
 0x139   : > { %2005 = vst [vmem:[#allocation8_spill] sm:$0xff] %v1652_v26  ;;  %v974_v38 = vmul.f32 %v1652_v26, %v1652_v26  ;;  %v936_v41 = vmul.f32 %v1652_v26, %v1649_v25 }
 0x13a   : > { %2007 = vst [vmem:[#allocation10_spill] sm:$0xff] %v1691_v58 }
 0x13b   : > { %982 = vrot.lane.b32.xlu1 %v974_v38, %s1373_s25  ;;  %944 = vrot.lane.b32.xlu2 %v936_v41, %s1373_s25  ;;  %v938_v38 = vmul.f32 %v1682_v51, %v1726_v27 }
 0x13e   : > { %v923_v55 = vpop.permute.xlu1 %922 }
 0x13f   : > { %v1694_v60 = vadd.f32 %v923_v55, %v1606_v47  ;;  %v1711_v47 = vpop.eup %1298 }
 0x140   : > { %v1716_v21 = vpop.eup %1300  ;;  %v397_v29 = vmul.f32 %v1711_v47, %v1660_v31 }
 0x141   : > { %2008 = vst [vmem:[#allocation11_spill] sm:$0xff] %v1694_v60  ;;  %v937_v63 = vmul.f32 %v1694_v60, %v1691_v58  ;;  %v975_v44 = vmul.f32 %v1694_v60, %v1694_v60  ;;  %v1720_v22 = vpop.eup %1302  ;;  %v385_v34 = vmul.f32 %v1716_v21, %v1666_v33 }
 0x142   : > { %v1305_v23 = vpop.eup %1304  ;;  %v398_v37 = vmul.f32 %v1711_v47, %v397_v29  ;;  %v373_v40 = vmul.f32 %v1720_v22, %v1672_v39 }
 0x143   : > { %986 = vrot.lane.b32.xlu1 %v976_v62, %s1373_s25  ;;  %946 = vrot.lane.b32.xlu0 %v937_v63, %s1373_s25  ;;  %v1307_v24 = vpop.eup %1306  ;;  %v361_v32 = vmul.f32 %v1305_v23, %v1676_v46  ;;  %v386_v55 = vmul.f32 %v1716_v21, %v385_v34 }
 0x144   : > { %984 = vrot.lane.b32.xlu2 %v975_v44, %s1373_s25  ;;  %v1309_v28 = vpop.eup %1308  ;;  %v441_v35 = vmul.f32 %v1307_v24, %v1679_v49  ;;  %v399_v51 = vmul.f32 0.5, %v398_v37  ;;  %v374_v25 = vmul.f32 %v1720_v22, %v373_v40 }
 0x145   : > { %v1311_v30 = vpop.eup %1310  ;;  %v349_v50 = vmul.f32 %v1309_v28, %v1685_v54  ;;  %v362_v52 = vmul.f32 %v1305_v23, %v361_v32  ;;  %v387_v3 = vmul.f32 0.5, %v386_v55 }
 0x146   : > { %v1313_v41 = vpop.eup %1312  ;;  %v429_v43 = vmul.f32 %v1311_v30, %v1688_v57  ;;  %v442_v63 = vmul.f32 %v1307_v24, %v441_v35  ;;  %v400_v40 = vsub.f32 1.5, %v399_v51 }
 0x147   : > { %v1315_v36 = vpop.eup %1314  ;;  %v907_v45 = vpop.permute.xlu0 %906  ;;  %v477_v48 = vmul.f32 %v1313_v41, %v1696_v61  ;;  %v350_v27 = vmul.f32 %v1309_v28, %v349_v50  ;;  %v363_v60 = vmul.f32 0.5, %v362_v52  ;;  %v388_v52 = vsub.f32 1.5, %v387_v3 }
 0x148   : > { %v1317_v42 = vpop.eup %1316  ;;  %v453_v62 = vmul.f32 %v1315_v36, %v1698_v53  ;;  %v1747_v29 = vadd.f32 %v907_v45, %v1612_v56  ;;  %v430_v26 = vmul.f32 %v1311_v30, %v429_v43  ;;  %v443_v0 = vmul.f32 0.5, %v442_v63 }
 0x149   : > { %v478_v32 = vmul.f32 %v1313_v41, %v477_v48  ;;  %v351_v45 = vmul.f32 0.5, %v350_v27  ;;  %v364_v48 = vsub.f32 1.5, %v363_v60 }
 0x14a   : > { %2010 = vst [vmem:[#allocation13_spill] sm:$0xff] %v1747_v29  ;;  %v454_v50 = vmul.f32 %v1315_v36, %v453_v62  ;;  %v431_v37 = vmul.f32 0.5, %v430_v26  ;;  %v444_v6 = vsub.f32 1.5, %v443_v0  ;;  %v401_v62 = vmul.f32 %v1711_v47, %v400_v40 }
 0x14b   : > { %948 = vrot.lane.b32.xlu0 %v938_v38, %s1373_s25  ;;  %v465_v38 = vmul.f32 %v1317_v42, %v1708_v20  ;;  %v479_v43 = vmul.f32 0.5, %v478_v32  ;;  %v352_v4 = vsub.f32 1.5, %v351_v45  ;;  %v365_v27 = vmul.f32 %v1305_v23, %v364_v48 }
 0x14c   : > { %v432_v55 = vsub.f32 1.5, %v431_v37  ;;  %v402_v3 = vmul.f32 %v401_v62, %v1660_v31  ;;  %v394_v48 = vand.u32 2147483648, %v1666_v33  ;;  %v406_v62 = vand.u32 2147483648, %v1660_v31 }
 0x14d   : > { %v466_v56 = vmul.f32 %v1317_v42, %v465_v38  ;;  %v480_v63 = vsub.f32 1.5, %v479_v43  ;;  %v389_v38 = vmul.f32 %v1716_v21, %v388_v52  ;;  %v353_v26 = vmul.f32 %v1309_v28, %v352_v4 }
 0x14e   : > { %v927_v44 = vpop.permute.xlu1 %926  ;;  %v433_v60 = vmul.f32 %v1311_v30, %v432_v55  ;;  %v366_v32 = vmul.f32 %v365_v27, %v1676_v46  ;;  %v450_v28 = vand.u32 2147483648, %v1679_v49  ;;  %v404_v27 = vsel %vm403_vm6, %v1660_v31, %v402_v3 }
 0x14f   : > { %v1750_v58 = vadd.f32 %v927_v44, %v1614_v59  ;;  %v375_v59 = vmul.f32 0.5, %v374_v25  ;;  %v455_v44 = vmul.f32 0.5, %v454_v50  ;;  %v467_v2 = vmul.f32 0.5, %v466_v56 }
 0x150   : > { %v481_v0 = vmul.f32 %v1313_v41, %v480_v63  ;;  %v390_v50 = vmul.f32 %v389_v38, %v1666_v33  ;;  %v434_v23 = vmul.f32 %v433_v60, %v1688_v57  ;;  %v486_v38 = vand.u32 2147483648, %v1696_v61 }
 0x151   : > { %v977_v34 = vmul.f32 %v1750_v58, %v1750_v58  ;;  %v939_v35 = vmul.f32 %v1750_v58, %v1747_v29  ;;  %v376_v29 = vsub.f32 1.5, %v375_v59  ;;  %v468_v25 = vsub.f32 1.5, %v467_v2 }
 0x152   : > { %v354_v2 = vmul.f32 %v353_v26, %v1685_v54  ;;  %v436_v45 = vsel %vm435_vm10, %v1688_v57, %v434_v23  ;;  %v462_v59 = vand.u32 2147483648, %v1698_v53  ;;  %vm588_vm6 = vcmask 72704  }
 0x153   : > { %988 = vrot.lane.b32.xlu0 %v977_v34, %s1373_s25  ;;  %950 = vrot.lane.b32.xlu2 %v939_v35, %s1373_s25  ;;  %v456_v34 = vsub.f32 1.5, %v455_v44  ;;  %v445_v35 = vmul.f32 %v1307_v24, %v444_v6  ;;  %v377_v51 = vmul.f32 %v1720_v22, %v376_v29  ;;  %v469_v6 = vmul.f32 %v1317_v42, %v468_v25 }
 0x154   : > { %v370_v22 = vand.u32 2147483648, %v1676_v46  ;;  %v368_v24 = vsel %vm367_vm3, %v1676_v46, %v366_v32  ;;  %v356_v42 = vsel %vm355_vm7, %v1685_v54, %v354_v2  ;;  %v438_v46 = vand.u32 2147483648, %v1688_v57 }
 0x155   : > { %v457_v47 = vmul.f32 %v1315_v36, %v456_v34  ;;  %v446_v21 = vmul.f32 %v445_v35, %v1679_v49  ;;  %v378_v4 = vmul.f32 %v377_v51, %v1672_v39  ;;  %v358_v36 = vand.u32 2147483648, %v1685_v54 }
 0x156   : > { %v382_v29 = vand.u32 2147483648, %v1672_v39  ;;  %v1790_v56 = vsel %vm369_vm9, %v370_v22, %v368_v24  ;;  %v470_v54 = vmul.f32 %v469_v6, %v1708_v20  ;;  %vm471_vm3 = vcmp.eq.f32.partialorder %v1708_v20, inf }
 0x157   : > { %v458_v30 = vmul.f32 %v457_v47, %v1698_v53  ;;  %v448_v41 = vsel %vm447_vm5, %v1679_v49, %v446_v21  ;;  %v380_v49 = vsel %vm379_vm4, %v1672_v39, %v378_v4  ;;  %v1804_v43 = vsel %vm357_vm13, %v358_v36, %v356_v42 }
 0x158   : > { %v1799_v37 = vsel %vm449_vm11, %v450_v28, %v448_v41  ;;  %1318 = vlog2.f32 %v1790_v56  ;;  %v1809_v57 = vsel %vm437_vm14, %v438_v46, %v436_v45  ;;  %v482_v39 = vmul.f32 %v481_v0, %v1696_v61 }
 0x159   : > { %v460_v40 = vsel %vm459_vm12, %v1698_v53, %v458_v30  ;;  %v1813_v52 = vsel %vm381_vm15, %v382_v29, %v380_v49  ;;  %1320 = vlog2.f32 %v1799_v37  ;;  %v392_v53 = vsel %vm391_vm2, %v1666_v33, %v390_v50 }
 0x15a   : > { %v474_v44 = vand.u32 2147483648, %v1708_v20  ;;  %v1820_v55 = vsel %vm461_vm0, %v462_v59, %v460_v40  ;;  %1322 = vlog2.f32 %v1804_v43  ;;  %v472_v63 = vsel %vm471_vm3, %v1708_v20, %v470_v54 }
 0x15b   : > { %vm473_vm4 = vcmp.eq.f32.partialorder %v1708_v20, 0.0  ;;  %1324 = vlog2.f32 %v1809_v57  ;;  %vm405_vm2 = vcmp.eq.f32.partialorder %v1660_v31, 0.0  ;;  %v484_v34 = vsel %vm483_vm8, %v1696_v61, %v482_v39 }
 0x15c   : > { %1326 = vlog2.f32 %v1813_v52  ;;  %vm485_vm5 = vcmp.eq.f32.partialorder %v1696_v61, 0.0  ;;  %v1839_v20 = vsel %vm393_vm1, %v394_v48, %v392_v53  ;;  %v1842_v25 = vsel %vm473_vm4, %v474_v44, %v472_v63 }
 0x15d   : > { %1328 = vlog2.f32 %v1820_v55  ;;  %v1844_v26 = vsel %vm405_vm2, %v406_v62, %v404_v27  ;;  %v1846_v60 = vsel %vm485_vm5, %v486_v38, %v484_v34  ;;  %vm596_vm7 = vcmask 65536  }
 0x15e   : > { %v1319_v35 = vpop.eup %1318  ;;  %1330 = vlog2.f32 %v1839_v20  ;;  %vm956_vm8 = vcmask 64512  }
 0x15f   : > { %v1321_v31 = vpop.eup %1320  ;;  %1332 = vlog2.f32 %v1842_v25  ;;  %v491_v61 = vmul.f32 0.6931472, %v1319_v35 }
 0x160   : > { %v1323_v51 = vpop.eup %1322  ;;  %1334 = vlog2.f32 %v1844_v26  ;;  %v516_v0 = vmul.f32 0.6931472, %v1321_v31 }
 0x161   : > { %v1325_v3 = vpop.eup %1324  ;;  %1336 = vlog2.f32 %v1846_v60  ;;  %v489_v50 = vmul.f32 0.6931472, %v1323_v51  ;;  %v499_v6 = vmul.f32 -0.7, %v491_v61 }
 0x162   : > { %v1327_v33 = vpop.eup %1326  ;;  %v514_v47 = vmul.f32 0.6931472, %v1325_v3  ;;  %v524_v22 = vmul.f32 -0.7, %v516_v0 }
 0x163   : > { %v1329_v32 = vpop.eup %1328  ;;  %v493_v21 = vmul.f32 0.6931472, %v1327_v33  ;;  %v498_v24 = vmul.f32 -0.7, %v489_v50  ;;  %v505_v46 = vmul.f32 1.442695, %v499_v6 }
 0x164   : > { %v1331_v2 = vpop.eup %1330  ;;  %v518_v4 = vmul.f32 0.6931472, %v1329_v32  ;;  %v523_v30 = vmul.f32 -0.7, %v514_v47  ;;  %v530_v49 = vmul.f32 1.442695, %v524_v22 }
 0x165   : > { %v1333_v23 = vpop.eup %1332  ;;  %v495_v36 = vmul.f32 0.6931472, %v1331_v2  ;;  %v500_v42 = vmul.f32 -0.7, %v493_v21  ;;  %v503_v54 = vmul.f32 1.442695, %v498_v24  ;;  %1338 = vpow2.f32 %v505_v46 }
 0x166   : > { %v1335_v28 = vpop.eup %1334  ;;  %v520_v29 = vmul.f32 0.6931472, %v1333_v23  ;;  %v525_v45 = vmul.f32 -0.7, %v518_v4  ;;  %v528_v39 = vmul.f32 1.442695, %v523_v30  ;;  %1340 = vpow2.f32 %v530_v49 }
 0x167   : > { %v1337_v41 = vpop.eup %1336  ;;  %v497_v59 = vmul.f32 0.6931472, %v1335_v28  ;;  %v501_v48 = vmul.f32 -0.7, %v495_v36  ;;  %v507_v53 = vmul.f32 1.442695, %v500_v42  ;;  %1342 = vpow2.f32 %v503_v54 }
 0x168   : > { %v522_v40 = vmul.f32 0.6931472, %v1337_v41  ;;  %v526_v44 = vmul.f32 -0.7, %v520_v29  ;;  %v532_v62 = vmul.f32 1.442695, %v525_v45  ;;  %1344 = vpow2.f32 %v528_v39 }
 0x169   : > { %v502_v63 = vmul.f32 -0.7, %v497_v59  ;;  %v509_v38 = vmul.f32 1.442695, %v501_v48  ;;  %1346 = vpow2.f32 %v507_v53  ;;  %v2012_v59 = vld [vmem:[#allocation3_spill] sm:$0xff]  ;;  %v2013_v54 = vld [vmem:[#allocation6_spill] sm:$0xff] }
 0x16a   : > { %v527_v27 = vmul.f32 -0.7, %v522_v40  ;;  %v534_v34 = vmul.f32 1.442695, %v526_v44  ;;  %1348 = vpow2.f32 %v532_v62  ;;  %v2015_v62 = vld [vmem:[#allocation4_spill] sm:$0xff] }
 0x16b   : > { %v1852_v35 = vpop.eup %1338  ;;  %v511_v31 = vmul.f32 1.442695, %v502_v63  ;;  %1350 = vpow2.f32 %v509_v38 }
 0x16c   : > { %v1854_v51 = vpop.eup %1340  ;;  %v536_v3 = vmul.f32 1.442695, %v527_v27  ;;  %1352 = vpow2.f32 %v534_v34  ;;  %v539_v50 = vmul.f32 %v1852_v35, %v1488_v13 }
 0x16d   : > { %v1856_v61 = vpop.eup %1342  ;;  %1354 = vpow2.f32 %v511_v31  ;;  %v544_v47 = vmul.f32 %v1854_v51, %v1496_v15 }
 0x16e   : > { %v1858_v33 = vpop.eup %1344  ;;  %1356 = vpow2.f32 %v536_v3  ;;  %v538_v21 = vmul.f32 %v1856_v61, %v1504_v17  ;;  %v553_v15 = vmul.f32 %v1856_v61, %v1501_v16  ;;  %v554_v17 = vmul.f32 %v1852_v35, %v1485_v12 }
 0x16f   : > { %v1860_v0 = vpop.eup %1346  ;;  %v543_v6 = vmul.f32 %v1858_v33, %v1512_v19  ;;  %v549_v13 = vsub.f32 %v539_v50, %v544_v47  ;;  %v558_v19 = vmul.f32 %v1858_v33, %v1509_v18  ;;  %v2011_v18 = vld [vmem:[#allocation5_spill] sm:$0xff] }
 0x170   : > { %v1862_v32 = vpop.eup %1348  ;;  %v540_v4 = vmul.f32 %v1860_v0, %v1474_v9  ;;  %v559_v9 = vmul.f32 %v1854_v51, %v1493_v14  ;;  %v555_v42 = vmul.f32 %v1860_v0, %v1469_v8 }
 0x171   : > { %v1351_v2 = vpop.eup %1350  ;;  %v545_v22 = vmul.f32 %v1862_v32, %v1480_v11  ;;  %v548_v28 = vsub.f32 %v538_v21, %v543_v6  ;;  %v560_v16 = vmul.f32 %v1862_v32, %v1477_v10  ;;  %v563_v46 = vsub.f32 %v553_v15, %v558_v19  ;;  %v2014_v10 = vld [vmem:[#allocation2_spill] sm:$0xff] }
 0x172   : > { %v1876_v23 = vpop.eup %1352  ;;  %v541_v11 = vmul.f32 %v1351_v2, %v1458_v5  ;;  %v564_v12 = vsub.f32 %v554_v17, %v559_v9  ;;  %v584_v49 = vmul.f32 %v549_v13, %v549_v13  ;;  %v556_v5 = vmul.f32 %v1351_v2, %v2012_v59 }
 0x173   : > { %v1355_v24 = vpop.eup %1354  ;;  %v546_v41 = vmul.f32 %v1876_v23, %v1466_v7  ;;  %v550_v36 = vsub.f32 %v540_v4, %v545_v22  ;;  %v583_v14 = vmul.f32 %v548_v28, %v548_v28  ;;  %v561_v7 = vmul.f32 %v1876_v23, %v2013_v54 }
 0x174   : > { %v1357_v30 = vpop.eup %1356  ;;  %v542_v29 = vmul.f32 %v1355_v24, %v1434_v1  ;;  %v565_v40 = vsub.f32 %v555_v42, %v560_v16  ;;  %v608_v39 = vmul.f32 %v563_v46, %v563_v46  ;;  %v609_v53 = vmul.f32 %v564_v12, %v564_v12 }
 0x175   : > { %v547_v45 = vmul.f32 %v1357_v30, %v2011_v18  ;;  %v551_v48 = vsub.f32 %v541_v11, %v546_v41  ;;  %v585_v8 = vmul.f32 %v550_v36, %v550_v36  ;;  %v557_v44 = vmul.f32 %v1355_v24, %v2014_v10 }
 0x176   : > { %v562_v63 = vmul.f32 %v1357_v30, %v2015_v62  ;;  %v566_v1 = vsub.f32 %v556_v5, %v561_v7  ;;  %v610_v27 = vmul.f32 %v565_v40, %v565_v40  ;;  %v613_v38 = vsel %vm588_vm6, %v608_v39, 0.0 }
 0x177   : > { %v614_v34 = vsel %vm588_vm6, %v609_v53, 0.0  ;;  %v589_v31 = vsel %vm588_vm6, %v583_v14, 0.0  ;;  %v590_v3 = vsel %vm588_vm6, %v584_v49, 0.0  ;;  %v552_v4 = vsub.f32 %v542_v29, %v547_v45 }
 0x178   : > { %v567_v50 = vsub.f32 %v557_v44, %v562_v63  ;;  %v611_v47 = vmul.f32 %v566_v1, %v566_v1  ;;  %v615_v21 = vadd.f32 %v614_v34, %v613_v38  ;;  %v616_v6 = vsel %vm588_vm6, %v610_v27, 0.0 }
 0x179   : > { %v586_v22 = vmul.f32 %v551_v48, %v551_v48  ;;  %v591_v13 = vadd.f32 %v590_v3, %v589_v31  ;;  %v587_v19 = vmul.f32 %v552_v4, %v552_v4  ;;  %v592_v9 = vsel %vm588_vm6, %v585_v8, 0.0 }
 0x17a   : > { %v612_v28 = vmul.f32 %v567_v50, %v567_v50  ;;  %v617_v15 = vadd.f32 %v616_v6, %v615_v21  ;;  %v618_v17 = vsel %vm588_vm6, %v611_v47, 0.0  ;;  %v568_v41 = vmul.f32 %v1856_v61, %v1804_v43 }
 0x17b   : > { %v594_v11 = vsel %vm588_vm6, %v586_v22, 0.0  ;;  %v593_v16 = vadd.f32 %v592_v9, %v591_v13  ;;  %v569_v46 = vmul.f32 %v1852_v35, %v1790_v56  ;;  %v597_v12 = vsel %vm596_vm7, %v587_v19, 0.0 }
 0x17c   : > { %v619_v36 = vadd.f32 %v618_v17, %v617_v15  ;;  %v620_v42 = vsel %vm596_vm7, %v612_v28, 0.0  ;;  %v570_v29 = vmul.f32 %v1860_v0, %v1813_v52  ;;  %v571_v18 = vmul.f32 %v1351_v2, %v1839_v20 }
 0x17d   : > { %v573_v45 = vmul.f32 %v1858_v33, %v1809_v57  ;;  %v595_v14 = vadd.f32 %v594_v11, %v593_v16  ;;  %v572_v43 = vmul.f32 %v1355_v24, %v1844_v26  ;;  %v574_v61 = vmul.f32 %v1854_v51, %v1799_v37 }
 0x17e   : > { %v621_v49 = vadd.f32 %v620_v42, %v619_v36  ;;  %v575_v56 = vmul.f32 %v1862_v32, %v1820_v55  ;;  %v576_v35 = vmul.f32 %v1876_v23, %v1842_v25  ;;  %v577_v52 = vmul.f32 %v1357_v30, %v1846_v60 }
 0x17f   : > { %v578_v0 = vsub.f32 %v568_v41, %v573_v45  ;;  %v598_v20 = vadd.f32 %v597_v12, %v595_v14  ;;  %v579_v2 = vsub.f32 %v569_v46, %v574_v61 }
 0x180   : > { %622 = vadd.xlane.f32.xlu2 %v621_v49  ;;  %v580_v57 = vsub.f32 %v570_v29, %v575_v56  ;;  %v581_v33 = vsub.f32 %v571_v18, %v576_v35  ;;  %v582_v59 = vsub.f32 %v572_v43, %v577_v52 }
 0x181   : > { %v631_v5 = vmul.f32 %v578_v0, %v578_v0  ;;  %599 = vadd.xlane.f32.xlu1 %v598_v20  ;;  %v632_v26 = vmul.f32 %v579_v2, %v579_v2 }
 0x182   : > { %v633_v24 = vmul.f32 %v580_v57, %v580_v57  ;;  %v634_v37 = vmul.f32 %v581_v33, %v581_v33  ;;  %v635_v55 = vmul.f32 %v582_v59, %v582_v59 }
 0x183   : > { %v636_v51 = vsel %vm588_vm6, %v631_v5, 0.0  ;;  %v637_v32 = vsel %vm588_vm6, %v632_v26, 0.0 }
 0x184   : > { %v638_v25 = vadd.f32 %v637_v32, %v636_v51  ;;  %v639_v60 = vsel %vm588_vm6, %v633_v24, 0.0  ;;  %v641_v23 = vsel %vm588_vm6, %v634_v37, 0.0  ;;  %v643_v54 = vsel %vm596_vm7, %v635_v55, 0.0 }
 0x186   : > { %v640_v30 = vadd.f32 %v639_v60, %v638_v25 }
 0x188   : > { %v642_v7 = vadd.f32 %v641_v23, %v640_v30 }
 0x18a   : > { %v644_v40 = vadd.f32 %v643_v54, %v642_v7 }
 0x18c   : > { %645 = vadd.xlane.f32.xlu0 %v644_v40 }
 0x195   : > { %v945_v39 = vpop.permute.xlu2 %944 }
 0x196   : > { %v957_v44 = vsel %vm956_vm8, %v945_v39, 0.0 }
 0x19e   : > { %v985_v48 = vpop.permute.xlu2 %984 }
 0x19f   : > { %v995_v47 = vsel %vm956_vm8, %v985_v48, 0.0 }
 0x1ad   : > { %v983_v8 = vpop.permute.xlu1 %982  ;;  %v951_v62 = vpop.permute.xlu2 %950 }
 0x1ae   : > { %v994_v31 = vsel %vm956_vm8, %v983_v8, 0.0  ;;  %v962_v3 = vsel %vm956_vm8, %v951_v62, 0.0 }
 0x1af   : > { %v996_v6 = vadd.f32 %v995_v47, %v994_v31 }
 0x1b5   : > { %v947_v53 = vpop.permute.xlu0 %946  ;;  %v987_v38 = vpop.permute.xlu1 %986 }
 0x1b6   : > { %v958_v10 = vsel %vm956_vm8, %v947_v53, 0.0  ;;  %v997_v21 = vsel %vm956_vm8, %v987_v38, 0.0  ;;  %v2017_v38 = vld [vmem:[#allocation8_spill] sm:$0xff] }
 0x1b7   : > { %v959_v63 = vadd.f32 %v958_v10, %v957_v44  ;;  %v998_v4 = vadd.f32 %v997_v21, %v996_v6  ;;  %v2019_v6 = vld [vmem:[#allocation9_spill] sm:$0xff] }
 0x1bd   : > { %v949_v1 = vpop.permute.xlu0 %948 }
 0x1be   : > { %v960_v27 = vsel %vm956_vm8, %v949_v1, 0.0  ;;  %v2016_v1 = vld [vmem:[#allocation11_spill] sm:$0xff] }
 0x1bf   : > { %v961_v34 = vadd.f32 %v960_v27, %v959_v63 }
 0x1c1   : > { %v963_v50 = vadd.f32 %v962_v3, %v961_v34 }
 0x1c3   : > { %964 = vadd.xlane.f32.xlu2 %v963_v50  ;;  %v2018_v50 = vld [vmem:[#allocation7_spill] sm:$0xff] }
 0x1c5   : > { %v989_v22 = vpop.permute.xlu0 %988 }
 0x1c6   : > { %v999_v13 = vsel %vm956_vm8, %v989_v22, 0.0  ;;  %v2020_v22 = vld [vmem:[#allocation10_spill] sm:$0xff] }
 0x1c7   : > { %v1000_v28 = vadd.f32 %v999_v13, %v998_v4 }
 0x1c9   : > { %1001 = vadd.xlane.f32.xlu1 %v1000_v28  ;;  %v2021_v28 = vld [vmem:[#allocation12_spill] sm:$0xff] }
 0x1f3   : > { %v623_v15 = vpop.xlane.xlu2 %622 }
 0x1f4   : > { %v624_v17 = vrot.slane %v623_v15, 4  ;;  %v600_v19 = vpop.xlane.xlu1 %599 }
 0x1f5   : > { %v601_v11 = vrot.slane %v600_v19, 4 }
 0x1f6   : > { %v625_v9 = vadd.f32 %v624_v17, %v623_v15 }
 0x1f7   : > { %v602_v36 = vadd.f32 %v601_v11, %v600_v19 }
 0x1f8   : > { %v626_v41 = vrot.slane %v625_v9, 2 }
 0x1f9   : > { %v603_v42 = vrot.slane %v602_v36, 2 }
 0x1fa   : > { %v627_v16 = vadd.f32 %v626_v41, %v625_v9  ;;  %v2022_v41 = vld [vmem:[#allocation13_spill] sm:$0xff] }
 0x1fb   : > { %v604_v46 = vadd.f32 %v603_v42, %v602_v36 }
 0x1fc   : > { %v628_v12 = vrot.slane %v627_v16, 1 }
 0x1fd   : > { %v605_v29 = vrot.slane %v604_v46, 1 }
 0x1fe   : > { %v629_v18 = vadd.f32 %v628_v12, %v627_v16 }
 0x1ff   : > { %v646_v45 = vpop.xlane.xlu0 %645  ;;  %v606_v49 = vadd.f32 %v605_v29, %v604_v46 }
 0x200   : > { %v647_v14 = vrot.slane %v646_v45, 4 }
 0x201   : > { %1274 = vpush %v606_v49 }
 0x202   : > { %v648_v43 = vadd.f32 %v647_v14, %v646_v45  ;;  %1276 = vpush %v629_v18 }
 0x204   : > { %v649_v61 = vrot.slane %v648_v43, 2 }
 0x206   : > { %v650_v56 = vadd.f32 %v649_v61, %v648_v43 }
 0x208   : > { %v651_v35 = vrot.slane %v650_v56, 1 }
 0x20a   : > { %v652_v52 = vadd.f32 %v651_v35, %v650_v56 }
 0x20c   : > { %1278 = vpush %v652_v52 }
 0x232   : > { %s1940_s26 = spop %1274 }
 0x233   : > { %s1942_s27 = spop %1276 }
 0x236   : > { %v965_v0 = vpop.xlane.xlu2 %964 }
 0x237   : > { %v966_v20 = vrot.slane %v965_v0, 4 }
 0x239   : > { %v967_v2 = vadd.f32 %v966_v20, %v965_v0 }
 0x23b   : > { %v968_v57 = vrot.slane %v967_v2, 2 }
 0x23c   : > { %v1002_v33 = vpop.xlane.xlu1 %1001 }
 0x23d   : > { %v1003_v59 = vrot.slane %v1002_v33, 4  ;;  %v969_v5 = vadd.f32 %v968_v57, %v967_v2  ;;  %s1944_s28 = spop %1278 }
 0x23f   : > { %v1004_v26 = vadd.f32 %v1003_v59, %v1002_v33  ;;  %v970_v24 = vrot.slane %v969_v5, 1 }
 0x241   : > { %v1005_v37 = vrot.slane %v1004_v26, 2  ;;  %v971_v51 = vadd.f32 %v970_v24, %v969_v5 }
 0x243   : > { %1280 = vpush %v971_v51  ;;  %v1006_v55 = vadd.f32 %v1005_v37, %v1004_v26 }
 0x245   : > { %v1007_v32 = vrot.slane %v1006_v55, 1 }
 0x247   : > { %v1008_v25 = vadd.f32 %v1007_v32, %v1006_v55 }
 0x249   : > { %1282 = vpush %v1008_v25 }
 0x274   : > { %s1281_s29 = spop %1280 }
 0x275   : > { %v973_v44 = vstv %s1281_s29 }
 0x27a   : > { %s1283_s30 = spop %1282 }
 0x27b   : > { %v1010_v60 = vstv %s1283_s30 }
 0x27c   : > { %v1011_v23 = vadd.f32 1e-08, %v1010_v60 }
 0x27e   : > { %1358 = vrcp.f32 %v1011_v23  ;;  %v1023_v40 = vand.u32 2147483648, %v1011_v23  ;;  %v1021_v48 = vand.u32 2147483647, %v1011_v23  ;;  %vm1017_vm10 = vweird.f32 %v1011_v23 }
 0x280   : > { %v1024_v53 = vor.u32 1.1754944e-38, %v1023_v40  ;;  %vm1022_vm12 = vcmp.eq.f32.partialorder %v1021_v48, 8.507059e+37 }
 0x284   : > { %v1359_v30 = vpop.eup %1358 }
 0x285   : > { %v1013_v54 = vmul.f32 %v1359_v30, %v1011_v23  ;;  %vm1018_vm9 = vweird.f32 %v1359_v30 }
 0x286   : > { %vm1019_vm11 = vmor %vm1017_vm10, %vm1018_vm9 }
 0x287   : > { %v1014_v7 = vsub.f32 1.0, %v1013_v54 }
 0x289   : > { %v1015_v39 = vmul.f32 %v1359_v30, %v1014_v7 }
 0x28b   : > { %v1016_v8 = vadd.f32 %v1359_v30, %v1015_v39 }
 0x28d   : > { %v1020_v10 = vsel %vm1019_vm11, %v1359_v30, %v1016_v8 }
 0x28e   : > { %v1025_v62 = vsel %vm1022_vm12, %v1024_v53, %v1020_v10 }
 0x28f   : > { %v1026_v63 = vmul.f32 %v1025_v62, %v973_v44 }
 0x291   : > { %v1028_v27 = vmul.f32 %v1026_v63, %v2016_v1  ;;  %v1027_v34 = vmul.f32 %v1026_v63, %v2017_v38  ;;  %v1029_v4 = vmul.f32 %v1026_v63, %v2019_v6  ;;  %v1030_v9 = vmul.f32 %v1026_v63, %v1750_v58 }
 0x292   : > { %v1129_v6 = vlaneseq }
 0x293   : > { %v1036_v31 = vmul.f32 %v1028_v27, %v1028_v27  ;;  %v1035_v3 = vmul.f32 %v1027_v34, %v1027_v34  ;;  %v1031_v47 = vsub.f32 %v2018_v50, %v1027_v34  ;;  %v1032_v13 = vsub.f32 %v2020_v22, %v1028_v27 }
 0x294   : > { %v1033_v15 = vsub.f32 %v2021_v28, %v1029_v4  ;;  %v1037_v19 = vmul.f32 %v1029_v4, %v1029_v4  ;;  %v1034_v36 = vsub.f32 %v2022_v41, %v1030_v9  ;;  %v1038_v42 = vmul.f32 %v1030_v9, %v1030_v9 }
 0x295   : > { %1045 = vrot.lane.b32.xlu0 %v1036_v31, %s1373_s25  ;;  %1043 = vrot.lane.b32.xlu2 %v1035_v3, %s1373_s25  ;;  %v1072_v21 = vmul.f32 %v1031_v47, %v1031_v47  ;;  %v1073_v17 = vmul.f32 %v1032_v13, %v1032_v13  ;;  %v1130_v22 = vand.u32 127, %v1129_v6  ;;  %v1138_v9 = vstv %s1942_s27 }
 0x296   : > { %v1074_v11 = vmul.f32 %v1033_v15, %v1033_v15  ;;  %v1075_v16 = vmul.f32 %v1034_v36, %v1034_v36  ;;  %v1140_v41 = vstv %s1940_s26 }
 0x297   : > { %1080 = vrot.lane.b32.xlu1 %v1072_v21, %s1373_s25  ;;  %vm1134_vm1 = vcmp.eq.s32.totalorder %v1130_v22, 3  ;;  %vm1133_vm3 = vcmp.eq.s32.totalorder %v1130_v22, 2  ;;  %vm1132_vm4 = vcmp.eq.s32.totalorder %v1130_v22, 1  ;;  %vm1131_vm2 = vcmp.eq.s32.totalorder %v1130_v22, 0 }
 0x29d   : > { %1082 = vrot.lane.b32.xlu0 %v1073_v17, %s1373_s25  ;;  %1047 = vrot.lane.b32.xlu2 %v1037_v19, %s1373_s25  ;;  %v1136_v17 = vstv %s1944_s28 }
 0x29f   : > { %1084 = vrot.lane.b32.xlu1 %v1074_v11, %s1373_s25 }
 0x2a5   : > { %1049 = vrot.lane.b32.xlu0 %v1038_v42, %s1373_s25  ;;  %1086 = vrot.lane.b32.xlu2 %v1075_v16, %s1373_s25 }
 0x2ef   : > { %v1044_v46 = vpop.permute.xlu2 %1043 }
 0x2f0   : > { %v1055_v35 = vsel %vm956_vm8, %v1044_v46, 0.0 }
 0x2f7   : > { %v1048_v12 = vpop.permute.xlu2 %1047 }
 0x2f8   : > { %v1058_v33 = vsel %vm956_vm8, %v1048_v12, 0.0 }
 0x2ff   : > { %v1087_v43 = vpop.permute.xlu2 %1086 }
 0x300   : > { %v1097_v2 = vsel %vm956_vm8, %v1087_v43, 0.0 }
 0x307   : > { %v1046_v29 = vpop.permute.xlu0 %1045 }
 0x308   : > { %v1056_v45 = vsel %vm956_vm8, %v1046_v29, 0.0 }
 0x309   : > { %v1081_v18 = vpop.permute.xlu1 %1080  ;;  %v1057_v0 = vadd.f32 %v1056_v45, %v1055_v35 }
 0x30a   : > { %v1092_v49 = vsel %vm956_vm8, %v1081_v18, 0.0 }
 0x30b   : > { %v1059_v5 = vadd.f32 %v1058_v33, %v1057_v0 }
 0x30f   : > { %v1083_v58 = vpop.permute.xlu0 %1082 }
 0x310   : > { %v1093_v14 = vsel %vm956_vm8, %v1083_v58, 0.0 }
 0x311   : > { %v1094_v61 = vadd.f32 %v1093_v14, %v1092_v49  ;;  %v1085_v56 = vpop.permute.xlu1 %1084 }
 0x312   : > { %v1095_v52 = vsel %vm956_vm8, %v1085_v56, 0.0 }
 0x313   : > { %v1096_v20 = vadd.f32 %v1095_v52, %v1094_v61 }
 0x315   : > { %v1098_v57 = vadd.f32 %v1097_v2, %v1096_v20 }
 0x317   : > { %v1050_v59 = vpop.permute.xlu0 %1049  ;;  %1099 = vadd.xlane.f32.xlu0 %v1098_v57 }
 0x318   : > { %v1060_v26 = vsel %vm956_vm8, %v1050_v59, 0.0 }
 0x319   : > { %v1061_v24 = vadd.f32 %v1060_v26, %v1059_v5 }
 0x31b   : > { %1062 = vadd.xlane.f32.xlu1 %v1061_v24 }
 0x38a   : > { %v1100_v37 = vpop.xlane.xlu0 %1099 }
 0x38b   : > { %v1101_v51 = vrot.slane %v1100_v37, 4 }
 0x38d   : > { %v1102_v55 = vadd.f32 %v1101_v51, %v1100_v37 }
 0x38e   : > { %v1063_v32 = vpop.xlane.xlu1 %1062 }
 0x38f   : > { %v1103_v25 = vrot.slane %v1102_v55, 2  ;;  %v1064_v60 = vrot.slane %v1063_v32, 4 }
 0x391   : > { %v1065_v23 = vadd.f32 %v1064_v60, %v1063_v32  ;;  %v1104_v30 = vadd.f32 %v1103_v25, %v1102_v55 }
 0x393   : > { %v1066_v54 = vrot.slane %v1065_v23, 2  ;;  %v1105_v40 = vrot.slane %v1104_v30, 1 }
 0x395   : > { %v1067_v7 = vadd.f32 %v1066_v54, %v1065_v23  ;;  %v1106_v8 = vadd.f32 %v1105_v40, %v1104_v30 }
 0x397   : > { %v1068_v39 = vrot.slane %v1067_v7, 1 }
 0x399   : > { %v1069_v48 = vadd.f32 %v1068_v39, %v1067_v7 }
 0x39b   : > { %1284 = vpush %v1069_v48 }
 0x39c   : > { %1286 = vpush %v1106_v8 }
 0x3cc   : > { %s1285_s7 = spop %1284 }
 0x3cd   : > { %s1287_s8 = spop %1286  ;;  %v1071_v3 = vstv %s1285_s7 }
 0x3ce   : > { %v1108_v53 = vstv %s1287_s8 }
 0x3cf   : > { %1360 = vrcp.f32 %v1108_v53  ;;  %v1120_v63 = vand.u32 2147483648, %v1108_v53  ;;  %v1118_v27 = vand.u32 2147483647, %v1108_v53  ;;  %vm1114_vm14 = vweird.f32 %v1108_v53 }
 0x3d1   : > { %v1121_v34 = vor.u32 1.1754944e-38, %v1120_v63  ;;  %vm1119_vm0 = vcmp.eq.f32.partialorder %v1118_v27, 8.507059e+37 }
 0x3d5   : > { %v1361_v10 = vpop.eup %1360 }
 0x3d6   : > { %v1110_v44 = vmul.f32 %v1361_v10, %v1108_v53  ;;  %vm1115_vm13 = vweird.f32 %v1361_v10 }
 0x3d7   : > { %vm1116_vm15 = vmor %vm1114_vm14, %vm1115_vm13 }
 0x3d8   : > { %v1111_v62 = vsub.f32 1.0, %v1110_v44 }
 0x3da   : > { %v1112_v1 = vmul.f32 %v1361_v10, %v1111_v62 }
 0x3dc   : > { %v1113_v38 = vadd.f32 %v1361_v10, %v1112_v1 }
 0x3de   : > { %v1117_v31 = vsel %vm1116_vm15, %v1361_v10, %v1113_v38 }
 0x3df   : > { %v1122_v50 = vsel %vm1119_vm0, %v1121_v34, %v1117_v31 }
 0x3e0   : > { %v1123_v47 = vmul.f32 %v1122_v50, %v1071_v3 }
 0x3e2   : > { %v1124_v21 = vadd.f32 1e-08, %v1123_v47 }
 0x3e4   : > { %1362 = vlog2.f32 %v1124_v21 }
 0x3ea   : > { %v1363_v4 = vpop.eup %1362 }
 0x3eb   : > { %v1126_v13 = vmul.f32 0.6931472, %v1363_v4 }
 0x3ed   : > { %v1127_v28 = vsub.f32 0.0, %v1126_v13 }
 0x3ef   : > { %v1128_v15 = vmul.f32 0.4342945, %v1127_v28 }
 0x3f1   : > { %v1135_v19 = vsel %vm1134_vm1, %v1128_v15, 0.0 }
 0x3f2   : > { %v1137_v11 = vsel %vm1133_vm3, %v1136_v17, %v1135_v19 }
 0x3f3   : > { %v1139_v36 = vsel %vm1132_vm4, %v1138_v9, %v1137_v11 }
 0x3f4   : > { %v1141_v42 = vsel %vm1131_vm2, %v1140_v41, %v1139_v36 }
 0x3f5   : > { %1142 = vst [vmem:[%s307_s11] sm:$0x1] %v1141_v42 }
 0x3f6 PF: > { %s16_s21 = sadd.s32 1, %s1370_s21  }
 0x3f7   : > { %p13_p4 = scmp.ge.s32.totalorder %s16_s21, 4  }
 0x3f9   :  { %15 = sbr.rel (!%p13_p4) target bundleno = 1 (0x1), region = 83 }

</bundles_post_ra>
